<compile_context>
chip_gen: v7x
topology: tpu7x:2x2x1
jax: 0.10.0
libtpu: 0.0.40
codegen_flags: <defaults>
</compile_context>

<pallas_src>
import functools

import jax
import jax.numpy as jnp
from jax.experimental import pallas as pl
from jax.experimental.pallas import tpu as pltpu


def _label_smoothing_kernel(pred_ref, tgt_ref, out_ref, acc_ref, *,
                            confidence, off_value, n_rows, n_tiles,
                            tile_n, tiles_per_core, has_overflow):
    c = pl.program_id(0)          # TensorCore axis (size 1 on single-TC chips)
    i = pl.program_id(1)          # reduction axis over batch tiles

    @pl.when(i == 0)
    def _():
        acc_ref[...] = jnp.zeros_like(acc_ref)

    tile_idx = c * tiles_per_core + i

    def _compute():
        tn, nc = pred_ref.shape
        x = pred_ref[...].astype(jnp.float32)                       # (tn, nc)
        tgt = tgt_ref[...]                                          # (tn, 1)

        # log-softmax pieces; every reduction is per-row, so garbage in padded
        # boundary rows cannot leak into valid rows.
        m = jnp.max(x, axis=-1, keepdims=True)
        z = x - m
        lse = jnp.log(jnp.sum(jnp.exp(z), axis=-1, keepdims=True))  # (tn, 1)

        # -sum(true_dist * logp) with sum(true_dist) == 1 exactly, so the lse
        # term folds into a per-row scalar; only the target gather needs a
        # full-tile select+reduce.
        sum_z = jnp.sum(z, axis=-1, keepdims=True)                  # (tn, 1)
        col = jax.lax.broadcasted_iota(jnp.int32, (tn, nc), 1)
        z_t = jnp.sum(jnp.where(col == tgt, z, 0.0), axis=-1, keepdims=True)
        row_loss = lse - off_value * sum_z - (confidence - off_value) * z_t

        if n_rows % tile_n == 0:
            partial = jnp.sum(row_loss)                             # fast path
        else:
            # Cheap (tn, 1) column mask for rows past the end of the batch
            # (NaN/Inf in those rows is discarded by the where, not multiplied).
            row_ids = tile_idx * tile_n + jax.lax.broadcasted_iota(
                jnp.int32, (tn, 1), 0)
            partial = jnp.sum(jnp.where(row_ids < n_rows, row_loss, 0.0))

        acc_ref[...] = acc_ref[...] + partial

    if has_overflow:
        # Odd n_tiles on the 2-core split: the clamped overflow step re-maps to
        # the previous block (so no extra DMA) and skips all compute here.
        pl.when(tile_idx < n_tiles)(_compute)
    else:
        _compute()

    @pl.when(i == tiles_per_core - 1)
    def _():
        out_ref[...] = acc_ref[...].reshape(out_ref.shape)


def _tpu_vmem_capacity_bytes():
    try:
        return int(pltpu.get_tpu_info().vmem_capacity_bytes)
    except Exception:
        return 64 * 1024 * 1024      # conservative (v7x-sized) fallback


def _detect_num_tensorcores():
    # Only v7x-class chips expose 2 TensorCores to one Pallas kernel; on
    # single-TC v5e/v6e a 2-wide core axis is just a longer serial loop.
    try:
        kind = jax.devices()[0].device_kind.lower()
    except Exception:
        return 1
    return 2 if ("v7" in kind or "7x" in kind) else 1


def _choose_tile_n(n_rows, n_classes, itemsize, num_cores, budget_bytes):
    """Largest multiple-of-8 batch tile fitting the per-chip VMEM budget."""
    # Per tile row: double-buffered pred block + ~3 tile-sized f32 in-kernel
    # temporaries + the lane-padded (tile_n, 1)->(tile_n, 128) int32 target
    # block (double-buffered).
    bytes_per_row = (2 * itemsize + 3 * 4) * n_classes + 2 * 128 * 4
    tile_n = max(8, (budget_bytes // bytes_per_row) // 8 * 8)
    per_core = -(-n_rows // num_cores)
    per_core = max(8, ((per_core + 7) // 8) * 8)
    return int(min(tile_n, per_core))


def label_smoothing_loss(pred, target, smoothing=0.0, tile_n=None):
    """weight=None path of LabelSmoothingLoss.forward (mean over rows)."""
    # TODO(synk): weighted path (weight is not None) returns a per-row vector
    # sum(-true_dist*logp*weight, -1)/sum(weight); not implemented here.
    # TODO(synk): add a class-axis-chunked (online log-softmax) path for
    # LLM-scale C (>~100k), where a single (tile_n, C) block overflows VMEM.
    N, C = pred.shape
    target = target.astype(jnp.int32).reshape(N, 1)

    confidence = 1.0 - float(smoothing)
    off_value = float(smoothing) / (C - 1) if C > 1 else 0.0   # guard C == 1

    vmem_cap = _tpu_vmem_capacity_bytes()
    budget_bytes = max(4 * 1024 * 1024, vmem_cap // 3)
    vmem_limit = int(vmem_cap * 3 // 4)
    itemsize = jnp.dtype(pred.dtype).itemsize

    def _run(requested_cores):
        tn = tile_n or _choose_tile_n(N, C, itemsize, requested_cores,
                                      budget_bytes)
        n_tiles = pl.cdiv(N, tn)
        num_cores = min(requested_cores, n_tiles)
        tiles_per_core = pl.cdiv(n_tiles, num_cores)
        last_block = n_tiles - 1
        has_overflow = num_cores * tiles_per_core != n_tiles

        if num_cores > 1 and hasattr(pltpu, "CORE_PARALLEL"):
            dim_sems = (pltpu.CORE_PARALLEL, pltpu.ARBITRARY)
        elif num_cores > 1:
            dim_sems = ("parallel", "arbitrary")
        else:
            dim_sems = ("arbitrary", "arbitrary")

        kernel = functools.partial(
            _label_smoothing_kernel,
            confidence=confidence,
            off_value=off_value,
            n_rows=N,
            n_tiles=n_tiles,
            tile_n=tn,
            tiles_per_core=tiles_per_core,
            has_overflow=has_overflow,
        )

        def _in_map(c, i):
            # Clamp so the (rare) overflow step's DMA stays in bounds and
            # re-targets the previous block; its compute is skipped in-kernel.
            return (jnp.minimum(c * tiles_per_core + i, last_block), 0)

        return pl.pallas_call(
            kernel,
            out_shape=jax.ShapeDtypeStruct((num_cores, 8, 128), jnp.float32),
            grid_spec=pltpu.PrefetchScalarGridSpec(
                num_scalar_prefetch=0,
                grid=(num_cores, tiles_per_core),
                in_specs=[
                    pl.BlockSpec((tn, C), _in_map),   # pred tile
                    pl.BlockSpec((tn, 1), _in_map),   # target tile
                ],
                out_specs=pl.BlockSpec((1, 8, 128), lambda c, i: (c, 0, 0)),
                scratch_shapes=[pltpu.VMEM((8, 128), jnp.float32)],
            ),
            compiler_params=pltpu.CompilerParams(
                dimension_semantics=dim_sems,
                vmem_limit_bytes=vmem_limit,
            ),
            cost_estimate=pl.CostEstimate(
                flops=6 * N * C,
                transcendentals=N * C + N,
                bytes_accessed=N * C * itemsize + 4 * N + 4,
            ),
        )(pred, target)

    requested = _detect_num_tensorcores()
    if requested > 1:
        try:
            out = _run(requested)
        except Exception:
            out = _run(1)   # single-core fallback if the core split is rejected
    else:
        out = _run(1)

    # Each core wrote its partial sum once (broadcast over its (8,128) block);
    # pick one element per core, combine, apply the mean over rows.
    return jnp.sum(out[:, 0, 0]) / N


def _reference_loss(pred, target, smoothing):
    logp = jax.nn.log_softmax(pred.astype(jnp.float32), axis=-1)
    N, C = pred.shape
    true_dist = jnp.full((N, C), smoothing / (C - 1), dtype=jnp.float32)
    true_dist = true_dist.at[jnp.arange(N), target.reshape(-1)].set(1.0 - smoothing)
    return jnp.mean(jnp.sum(-true_dist * logp, axis=-1))


if __name__ == "__main__":
    smoothing = 0.1
    key = jax.random.PRNGKey(0)

    # Test 1: small, divisible batch (interior fast path, no row mask).
    N, C = 16, 32
    kp, kt, key = jax.random.split(key, 3)
    pred = jax.random.normal(kp, (N, C), dtype=jnp.float32)
    target = jax.random.randint(kt, (N, 1), 0, C, dtype=jnp.int32)
    loss = jax.block_until_ready(label_smoothing_loss(pred, target, smoothing))
    ref = _reference_loss(pred, target, smoothing)
    assert jnp.allclose(loss, ref, rtol=1e-5, atol=1e-5), (loss, ref)

    # Test 2: non-divisible batch exercises the masked boundary tile.
    N2 = 13
    kp2, kt2, key = jax.random.split(key, 3)
    pred2 = jax.random.normal(kp2, (N2, C), dtype=jnp.float32)
    target2 = jax.random.randint(kt2, (N2, 1), 0, C, dtype=jnp.int32)
    loss2 = jax.block_until_ready(label_smoothing_loss(pred2, target2, smoothing))
    ref2 = _reference_loss(pred2, target2, smoothing)
    assert jnp.allclose(loss2, ref2, rtol=1e-5, atol=1e-5), (loss2, ref2)

    # Test 3: bf16 pred, multi-tile batch (explicit tile_n forces the
    # multi-step reduction + boundary-mask + possible overflow-tile path).
    N3, C3 = 40, 128
    kp3, kt3 = jax.random.split(key)
    pred3 = jax.random.normal(kp3, (N3, C3), dtype=jnp.bfloat16)
    target3 = jax.random.randint(kt3, (N3, 1), 0, C3, dtype=jnp.int32)
    loss3 = jax.block_until_ready(
        label_smoothing_loss(pred3, target3, smoothing, tile_n=16))
    ref3 = _reference_loss(pred3, target3, smoothing)
    assert jnp.allclose(loss3, ref3, rtol=1e-4, atol=1e-4), (loss3, ref3)

    print("KERNEL_OK")
</pallas_src>

<mosaic_0001>
module attributes {stable_mosaic.version = 11 : i64} {
  func.func @_label_smoothing_kernel(%arg0: i32, %arg1: i32, %arg2: memref<16x32xf32, #tpu.memory_space<vmem>>, %arg3: memref<16x1xi32, #tpu.memory_space<vmem>>, %arg4: memref<1x8x128xf32, #tpu.memory_space<vmem>>, %arg5: memref<8x128xf32, #tpu.memory_space<vmem>>) attributes {dimension_semantics = [#tpu.dimension_semantics<arbitrary>, #tpu.dimension_semantics<arbitrary>], iteration_bounds = array<i64: 1, 1>, scalar_prefetch = 0 : i64, scratch_operands = 1 : i64, tpu.core_type = #tpu.core_type<tc>, window_params = [{transform_indices = @transform_0, window_bounds = array<i64: 16, 32>}, {transform_indices = @transform_1, window_bounds = array<i64: 16, 1>}, {transform_indices = @transform_2, window_bounds = array<i64: 1, 8, 128>}]} {
    %c0_i32 = arith.constant 0 : i32
    %0 = arith.cmpi eq, %arg1, %c0_i32 : i32
    %1 = arith.extui %0 : i1 to i32
    %c0_i32_0 = arith.constant 0 : i32
    %2 = arith.cmpi ne, %1, %c0_i32_0 : i32
    scf.if %2 {
      %cst_17 = arith.constant 0.000000e+00 : f32
      %39 = vector.broadcast %cst_17 : f32 to vector<8x128xf32>
      %c0_18 = arith.constant 0 : index
      %c0_19 = arith.constant 0 : index
      %40 = vector.load %arg5[%c0_18, %c0_19] : memref<8x128xf32, #tpu.memory_space<vmem>>, vector<8x128xf32>
      tpu.vector_store %arg5[%c0_18, %c0_19], %39 {strides = array<i32>} : memref<8x128xf32, #tpu.memory_space<vmem>>, vector<8x128xf32>,
    } else {
    }
    %c0 = arith.constant 0 : index
    %c0_1 = arith.constant 0 : index
    %3 = vector.load %arg2[%c0, %c0_1] : memref<16x32xf32, #tpu.memory_space<vmem>>, vector<16x32xf32>
    %c0_2 = arith.constant 0 : index
    %c0_3 = arith.constant 0 : index
    %4 = vector.load %arg3[%c0_2, %c0_3] : memref<16x1xi32, #tpu.memory_space<vmem>>, vector<16x1xi32>
    %cst = arith.constant dense<0xFF800000> : vector<16xf32>
    %5 = vector.multi_reduction <maximumf>, %3, %cst [1] : vector<16x32xf32> to vector<16xf32>
    %6 = vector.shape_cast %5 : vector<16xf32> to vector<16x1xf32>
    %7 = vector.broadcast %6 : vector<16x1xf32> to vector<16x32xf32>
    %8 = arith.subf %3, %7 : vector<16x32xf32>
    %9 = math.exp %8 : vector<16x32xf32>
    %cst_4 = arith.constant dense<0.000000e+00> : vector<16xf32>
    %10 = vector.multi_reduction <add>, %9, %cst_4 [1] : vector<16x32xf32> to vector<16xf32>
    %11 = vector.shape_cast %10 : vector<16xf32> to vector<16x1xf32>
    %12 = math.log %11 : vector<16x1xf32>
    %cst_5 = arith.constant dense<0.000000e+00> : vector<16xf32>
    %13 = vector.multi_reduction <add>, %8, %cst_5 [1] : vector<16x32xf32> to vector<16xf32>
    %14 = vector.shape_cast %13 : vector<16xf32> to vector<16x1xf32>
    %15 = tpu.iota {dimensions = array<i32: 1>} : vector<16x32xi32>
    %16 = vector.broadcast %4 : vector<16x1xi32> to vector<16x32xi32>
    %17 = arith.cmpi eq, %15, %16 : vector<16x32xi32>
    %cst_6 = arith.constant 0.000000e+00 : f32
    %18 = vector.broadcast %cst_6 : f32 to vector<16x32xf32>
    %19 = arith.select %17, %8, %18 : vector<16x32xi1>, vector<16x32xf32>
    %cst_7 = arith.constant dense<0.000000e+00> : vector<16xf32>
    %20 = vector.multi_reduction <add>, %19, %cst_7 [1] : vector<16x32xf32> to vector<16xf32>
    %21 = vector.shape_cast %20 : vector<16xf32> to vector<16x1xf32>
    %cst_8 = arith.constant 0.0032258064 : f32
    %22 = vector.broadcast %cst_8 : f32 to vector<16x1xf32>
    %23 = arith.mulf %22, %14 : vector<16x1xf32>
    %24 = arith.subf %12, %23 : vector<16x1xf32>
    %cst_9 = arith.constant 0.896774172 : f32
    %25 = vector.broadcast %cst_9 : f32 to vector<16x1xf32>
    %26 = arith.mulf %25, %21 : vector<16x1xf32>
    %27 = arith.subf %24, %26 : vector<16x1xf32>
    %28 = vector.shape_cast %27 : vector<16x1xf32> to vector<1x16x1xf32>
    %cst_10 = arith.constant dense<0.000000e+00> : vector<1xf32>
    %29 = vector.multi_reduction <add>, %28, %cst_10 [1, 2] : vector<1x16x1xf32> to vector<1xf32>
    %30 = vector.shape_cast %29 : vector<1xf32> to vector<1x1x1xf32>
    %31 = vector.extract %30[0, 0, 0] : f32 from vector<1x1x1xf32>
    %c0_11 = arith.constant 0 : index
    %c0_12 = arith.constant 0 : index
    %32 = vector.load %arg5[%c0_11, %c0_12] : memref<8x128xf32, #tpu.memory_space<vmem>>, vector<8x128xf32>
    %33 = vector.broadcast %31 : f32 to vector<8x128xf32>
    %34 = arith.addf %32, %33 : vector<8x128xf32>
    %c0_13 = arith.constant 0 : index
    %c0_14 = arith.constant 0 : index
    %35 = vector.load %arg5[%c0_13, %c0_14] : memref<8x128xf32, #tpu.memory_space<vmem>>, vector<8x128xf32>
    tpu.vector_store %arg5[%c0_13, %c0_14], %34 {strides = array<i32>} : memref<8x128xf32, #tpu.memory_space<vmem>>, vector<8x128xf32>,
    %c0_i32_15 = arith.constant 0 : i32
    %36 = arith.cmpi eq, %arg1, %c0_i32_15 : i32
    %37 = arith.extui %36 : i1 to i32
    %c0_i32_16 = arith.constant 0 : i32
    %38 = arith.cmpi ne, %37, %c0_i32_16 : i32
    scf.if %38 {
      %c0_17 = arith.constant 0 : index
      %c0_18 = arith.constant 0 : index
      %39 = vector.load %arg5[%c0_17, %c0_18] : memref<8x128xf32, #tpu.memory_space<vmem>>, vector<8x128xf32>
      %40 = vector.shape_cast %39 : vector<8x128xf32> to vector<1x8x128xf32>
      %c0_19 = arith.constant 0 : index
      %c0_20 = arith.constant 0 : index
      %c0_21 = arith.constant 0 : index
      %41 = vector.load %arg4[%c0_19, %c0_20, %c0_21] : memref<1x8x128xf32, #tpu.memory_space<vmem>>, vector<1x8x128xf32>
      tpu.vector_store %arg4[%c0_19, %c0_20, %c0_21], %40 {strides = array<i32>} : memref<1x8x128xf32, #tpu.memory_space<vmem>>, vector<1x8x128xf32>,
    } else {
    }
    return
  }
  func.func @transform_0(%arg0: i32, %arg1: i32) -> (i32, i32) {
    %c1_i32 = arith.constant 1 : i32
    %0 = arith.muli %arg0, %c1_i32 : i32
    %1 = arith.addi %0, %arg1 : i32
    %c0_i32 = arith.constant 0 : i32
    %2 = arith.minsi %1, %c0_i32 : i32
    %c0_i32_0 = arith.constant 0 : i32
    %c0_i32_1 = arith.constant 0 : i32
    return %2, %c0_i32_0 : i32, i32
  }
  func.func @transform_1(%arg0: i32, %arg1: i32) -> (i32, i32) {
    %c1_i32 = arith.constant 1 : i32
    %0 = arith.muli %arg0, %c1_i32 : i32
    %1 = arith.addi %0, %arg1 : i32
    %c0_i32 = arith.constant 0 : i32
    %2 = arith.minsi %1, %c0_i32 : i32
    %c0_i32_0 = arith.constant 0 : i32
    %c0_i32_1 = arith.constant 0 : i32
    return %2, %c0_i32_0 : i32, i32
  }
  func.func @transform_2(%arg0: i32, %arg1: i32) -> (i32, i32, i32) {
    %c0_i32 = arith.constant 0 : i32
    %c0_i32_0 = arith.constant 0 : i32
    %c0_i32_1 = arith.constant 0 : i32
    return %arg0, %c0_i32, %c0_i32_0 : i32, i32, i32
  }
}

</mosaic_0001>

<bundles_post_ra>
// kernel: tpu_custom_call.1
= control target key start
LH: loop header
LB: loop body
LE: loop exit
PB: predicated region body
PF: predicated region fallthrough
CT: control target
= control target key end

     0   :  { %vm85_vm0 = vcmask 261120   ;;  %v226_v4 = vmov 0   ;;  %s275_s0 = inlined_call_operand.vmem [shape: f32[16,32], index: 0, kind: input, shape index: {}]   ;;  %s276_s1 = inlined_call_operand.vmem [shape: s32[16,1], index: 1, kind: input, shape index: {}]   ;;  %s277_s2 = inlined_call_operand.hbm [shape: f32[1,8,128], index: 2, kind: output, shape index: {}]  }
   0x1   :  { %v81_v0 = vld [vmem:[%s275_s0] sm:$0xff]  ;;  %v82_v1 = vld [vmem:[%s275_s0 + $0x8] sm:$0xff]  ;;  %192 = vset.pattern.permute.xlu1 %v226_v4  ;;  %193 = vset.pattern.permute.xlu0 %v226_v4 }
   0x2   :  { %v83_v2 = vld [vmem:[%s276_s1] sm:$0xff]  ;;  %v86_v3 = vsel %vm85_vm0, %v81_v0, -inf }
   0x3   :  { %7 = vsyncpa [#allocation4], 0  ;;  %87 = vmax.xlane.f32.xlu0 %v86_v3  ;;  %117 = vperm.xlu1 %192, %v83_v2   ;;  %v89_v5 = vsel %vm85_vm0, %v82_v1, -inf  ;;  %v84_v6 = vld [vmem:[%s276_s1 + $0x8] sm:$0xff]  ;;  %v114_v13 = vlaneseq  ;;  %vm140_vm3 = vcmask 7168   ;;  %s227_s0 = smov [#allocation3]  }
   0x4   :  { %s168_s1 = sshll.u32 %s227_s0, 4  ;;  %s169_s1 = int_to_ptr.vmem [resolvable:$true] %s168_s1 }
   0x5   :  { %v115_v17 = vand.u32 127, %v114_v13  ;;  %s202_s18 = scalar_lea.vmem %s169_s1, 128  ;;  %p207_p1 = scmp.lt.s32.totalorder %s169_s1, %s169_s1 }
   0x6   :  { %p203_p0 = scmp.ne.s32.totalorder %s169_s1, %s202_s18  ;;  %p208_p2 = scmp.lt.s32.totalorder %s202_s18, %s202_s18 }
   0x7   :  { %90 = vmax.xlane.f32.xlu0 %v89_v5  ;;  %120 = vperm.xlu1 %192, %v84_v6  }
   0x8   :  { %p209_p3 = por %p208_p2, %p207_p1 }
   0xa   :  { %p210_p4 = pnand %p209_p3, %p203_p0 }
  0x82   :  { %v118_v16 = vpop.permute.xlu1 %117 }
  0x83   :  { %vm122_vm1 = vcmp.eq.s32.totalorder %v115_v17, %v118_v16 }
  0x86   :  { %v121_v21 = vpop.permute.xlu1 %120 }
  0x87   :  { %vm123_vm2 = vcmp.eq.s32.totalorder %v115_v17, %v121_v21 }
  0x90   :  { %v88_v7 = vpop.xlane.xlu0 %87 }
  0x91   :  { %v92_v8 = vsub.f32 %v81_v0, %v88_v7 }
  0x93   :  { %v94_v9 = vmul.f32 1.442695, %v92_v8  ;;  %v108_v19 = vsel %vm85_vm0, %v92_v8, 0.0  ;;  %v124_v23 = vsel %vm122_vm1, %v92_v8, 0.0 }
  0x94   :  { %v91_v10 = vpop.xlane.xlu0 %90  ;;  %v126_v24 = vsel %vm85_vm0, %v124_v23, 0.0 }
  0x95   :  { %194 = vpow2.f32 %v94_v9  ;;  %v93_v11 = vsub.f32 %v82_v1, %v91_v10 }
  0x97   :  { %v96_v12 = vmul.f32 1.442695, %v93_v11  ;;  %v111_v22 = vsel %vm85_vm0, %v93_v11, 0.0  ;;  %v125_v25 = vsel %vm123_vm2, %v93_v11, 0.0 }
  0x98   :  { %v129_v26 = vsel %vm85_vm0, %v125_v25, 0.0 }
  0x99   :  { %196 = vpow2.f32 %v96_v12 }
  0x9f   :  { %v195_v14 = vpop.eup %194 }
  0xa0   :  { %v98_v15 = vsel %vm85_vm0, %v195_v14, 0.0 }
  0xa1   :  { %99 = vadd.xlane.f32.xlu0 %v98_v15 }
  0xa3   :  { %v197_v18 = vpop.eup %196 }
  0xa4   :  { %v101_v20 = vsel %vm85_vm0, %v197_v18, 0.0 }
  0xa5   :  { %109 = vadd.xlane.f32.xlu0 %v108_v19  ;;  %102 = vadd.xlane.f32.xlu1 %v101_v20 }
  0xa9   :  { %112 = vadd.xlane.f32.xlu0 %v111_v22 }
  0xad   :  { %127 = vadd.xlane.f32.xlu0 %v126_v24 }
  0xb1   :  { %130 = vadd.xlane.f32.xlu0 %v129_v26 }
 0x12e   :  { %v100_v27 = vpop.xlane.xlu0 %99 }
 0x12f   :  { %198 = vlog2.f32 %v100_v27 }
 0x132   :  { %v103_v28 = vpop.xlane.xlu1 %102  ;;  %v110_v29 = vpop.xlane.xlu0 %109 }
 0x133   :  { %200 = vlog2.f32 %v103_v28  ;;  %v132_v33 = vmul.f32 0.0032258064, %v110_v29 }
 0x136   :  { %v113_v30 = vpop.xlane.xlu0 %112 }
 0x137   :  { %v133_v39 = vmul.f32 0.0032258064, %v113_v30 }
 0x139   :  { %v199_v31 = vpop.eup %198 }
 0x13a   :  { %v105_v32 = vmul.f32 0.6931472, %v199_v31  ;;  %v128_v34 = vpop.xlane.xlu0 %127 }
 0x13b   :  { %v136_v36 = vmul.f32 0.8967742, %v128_v34 }
 0x13c   :  { %v134_v35 = vsub.f32 %v105_v32, %v132_v33 }
 0x13d   :  { %v201_v37 = vpop.eup %200 }
 0x13e   :  { %v107_v38 = vmul.f32 0.6931472, %v201_v37  ;;  %v131_v40 = vpop.xlane.xlu0 %130  ;;  %v138_v43 = vsub.f32 %v134_v35, %v136_v36 }
 0x13f   :  { %v137_v41 = vmul.f32 0.8967742, %v131_v40 }
 0x140   :  { %v135_v42 = vsub.f32 %v107_v38, %v133_v39  ;;  %v141_v45 = vsel %vm140_vm3, %v138_v43, 0.0 }
 0x142   :  { %v139_v44 = vsub.f32 %v135_v42, %v137_v41 }
 0x144   :  { %v142_v46 = vsel %vm140_vm3, %v139_v44, 0.0 }
 0x145   :  { %v143_v47 = vadd.f32 %v142_v46, %v141_v45 }
 0x147   :  { %144 = vadd.xlane.f32.xlu0 %v143_v47 }
 0x1d4   :  { %v145_v48 = vpop.xlane.xlu0 %144 }
 0x1d5   :  { %v146_v49 = vrot.slane %v145_v48, 4 }
 0x1d7   :  { %v147_v50 = vadd.f32 %v146_v49, %v145_v48 }
 0x1d9   :  { %v148_v51 = vrot.slane %v147_v50, 2 }
 0x1db   :  { %v149_v52 = vadd.f32 %v148_v51, %v147_v50 }
 0x1dd   :  { %v150_v53 = vrot.slane %v149_v52, 1 }
 0x1df   :  { %v151_v54 = vadd.f32 %v150_v53, %v149_v52 }
 0x1e1   :  { %188 = vpush %v151_v54 }
 0x212   :  { %s189_s17 = spop %188 }
 0x213   :  { %v154_v55 = vstv %s189_s17 }
 0x214   :  { %161 = vst [vmem:[#allocation3] sm:$0xff] %v154_v55 }
 0x215   :  { %213 = shalt.err (!%p210_p4)
}
 0x216   :  { %s214_s21 = scalar_lea.hbm %s277_s2, 128 }
 0x217   :  { %p215_p5 = scmp.ne.s32.totalorder %s277_s2, %s214_s21  ;;  %p218_p6 = scmp.lt.u32.totalorder %s214_s21, %s277_s2 }
 0x219   :  { %p220_p7 = pnand %p218_p6, %p215_p5 }
 0x21b   :  { %223 = shalt.err (!%p220_p7)
}
 0x21c   :  { %171 = dma.vmem_to_hbm [thread:$0]  %s169_s1, 128, %s277_s2, [#allocation4]  }
 0x21d   :  { %224 = dma.done.wait [#allocation4], 128  }
 0x21e   :  { %225 = vsyncadd [#allocation4], 4294967168 }
 0x21f   :  { %175 = vsyncpa [#allocation4], 1 }

</bundles_post_ra>
